<compile_context>
chip_gen: v5e
topology: v5e:2x2
jax: 0.10.0
libtpu: 0.0.40
codegen_flags: <defaults>
</compile_context>

<pallas_src>
import math
import jax
import jax.numpy as jnp
from jax.experimental import pallas as pl
from jax.experimental.pallas import tpu as pltpu


# ---------------------------------------------------------------------------
# Pallas kernel: broadcast-add of the (flattened, lane-dense) PE table.
# ---------------------------------------------------------------------------
def _add_pe_kernel(x_ref, pe_ref, o_ref):
    # x_ref : (TB, TN) block of the flattened input
    # pe_ref: (1,  TN) block of the flattened PE table (broadcast over batch)
    # o_ref : (TB, TN)
    o_ref[...] = x_ref[...] + pe_ref[...]


def _round_up(a: int, m: int) -> int:
    return (a + m - 1) // m * m


def _vmem_budget():
    """(target_block_bytes, vmem_limit_bytes), chosen per chip generation."""
    try:
        cap = int(pltpu.get_tpu_info().vmem_capacity_bytes)
    except Exception:
        cap = 64 << 20  # conservative (v7x-sized) fallback
    if cap >= (100 << 20):
        # v5e / v6e: 128 MiB physical VMEM -> big blocks, fewer grid steps.
        return 8 << 20, 64 << 20
    # v7x: 64 MiB physical / 32 MiB scoped.
    return 4 << 20, 32 << 20


def add_position_encoding(x: jax.Array, pe_flat: jax.Array,
                          *, force_pallas: bool = False) -> jax.Array:
    """x: [B, S, D]; pe_flat: [1, max_len*D] (max_len >= S) -> [B, S, D]."""
    B, S, D = x.shape
    one, NF = pe_flat.shape
    assert one == 1 and NF % D == 0 and NF >= S * D

    N = S * D                                  # flattened, lane-dense axis
    if pe_flat.dtype != x.dtype:               # no-op on the module's own path
        pe_flat = pe_flat.astype(x.dtype)
    itemsize = jnp.dtype(x.dtype).itemsize

    # ---- small-problem fallback --------------------------------------------
    # A standalone pallas_call's fixed launch/pipeline cost dominates tiny
    # inputs; XLA's fused elementwise add is strictly faster there.
    if not force_pallas and B * N * itemsize < (512 << 10):
        return x + pe_flat[0, :N].reshape(1, S, D)

    x2 = x.reshape(B, N)                       # row-major, free

    # ---- tile choice ---------------------------------------------------------
    # Dtype-aware sublane tile: 8 f32 / 16 bf16 / 32 int8 (full vreg packing).
    native_sub = 8 * max(1, 4 // itemsize)
    TB = B if B <= native_sub else native_sub

    # Lane tile: multiple of 128, sized so one x block <= target_block_bytes.
    # Double-buffered x + out + pe stays comfortably under the vmem limit.
    target_block_bytes, vmem_limit = _vmem_budget()
    budget_lanes = max(128, (target_block_bytes // (TB * itemsize)) // 128 * 128)
    TN = min(_round_up(N, 128), budget_lanes)

    # Feed both v7x TensorCores: never let the grid collapse to a single
    # program when the N axis can be split into >=2 lane-aligned tiles.
    if pl.cdiv(B, TB) == 1 and pl.cdiv(N, TN) == 1 and N > 128:
        TN = min(TN, _round_up(pl.cdiv(N, 2), 128))

    # Grid: N outer, B inner.  The PE block index is constant across the inner
    # B loop, so Pallas skips re-fetching the same PE tile per batch tile.
    grid = (pl.cdiv(N, TN), pl.cdiv(B, TB))

    out = pl.pallas_call(
        _add_pe_kernel,
        out_shape=jax.ShapeDtypeStruct((B, N), x.dtype),
        grid=grid,
        in_specs=[
            pl.BlockSpec((TB, TN), lambda n, b: (b, n)),
            # NOTE: when N % TN != 0, the last N-tile of this spec reads PE
            # columns past S*D (i.e. rows >= S of the table).  The matching
            # output region is discarded by Pallas, so this is benign — do
            # NOT "fix" it by slicing the table on the host.
            pl.BlockSpec((1, TN), lambda n, b: (0, n)),
        ],
        out_specs=pl.BlockSpec((TB, TN), lambda n, b: (b, n)),
        input_output_aliases={0: 0},           # donate x's buffer to the output
        compiler_params=pltpu.CompilerParams(
            dimension_semantics=("parallel", "parallel"),
            vmem_limit_bytes=vmem_limit,
        ),
    )(x2, pe_flat)

    return out.reshape(B, S, D)


# ---------------------------------------------------------------------------
# Parameter / buffer construction (plain JAX glue, init-time only).
# ---------------------------------------------------------------------------
def make_fixed_pe(d_model: int, max_len: int, scale_factor: float = 1.0,
                  dtype=jnp.float32) -> jax.Array:
    """Sinusoidal table identical to FixedPositionalEncoding's buffer (per (s, d))."""
    position = jnp.arange(max_len, dtype=jnp.float32)[:, None]              # [S, 1]
    div_term = jnp.exp(
        jnp.arange(0, d_model, 2, dtype=jnp.float32) * (-math.log(10000.0) / d_model)
    )                                                                        # [D/2]
    pe = jnp.zeros((max_len, d_model), dtype=jnp.float32)
    pe = pe.at[:, 0::2].set(jnp.sin(position * div_term))
    pe = pe.at[:, 1::2].set(jnp.cos(position * div_term))
    return (scale_factor * pe).astype(dtype)                                 # [S, D]


def make_learnable_pe(key, d_model: int, max_len: int, dtype=jnp.float32) -> jax.Array:
    """Stand-in for kaiming_uniform_(a=sqrt(5)) on a (1, max_len, d_model) parameter:
    uniform(-bound, bound) with bound = 1/sqrt(fan_in), fan_in = max_len*d_model."""
    bound = 1.0 / math.sqrt(max_len * d_model)
    return jax.random.uniform(
        key, (max_len, d_model), dtype=jnp.float32, minval=-bound, maxval=bound
    ).astype(dtype)


class AbsolutePositionEncoding:
    """JAX/Pallas counterpart of the PyTorch AbsolutePositionEncoding module."""

    def __init__(self, pe_mode: str, d_model: int, win_size: int, key=None,
                 dtype=jnp.float32):
        if pe_mode == "fixed":
            pe = make_fixed_pe(d_model, max_len=win_size, dtype=dtype)
        elif pe_mode == "learnable":
            assert key is not None
            pe = make_learnable_pe(key, d_model, max_len=win_size, dtype=dtype)
        else:
            raise ValueError(
                "Expected `fixed` or `learnable`, but got `{}`".format(pe_mode)
            )
        self.pe_table = pe                                       # [max_len, D]
        # Hoisted: flatten + dtype cast once (not per call).
        self.pe_flat = pe.reshape(1, win_size * d_model)         # [1, max_len*D]

    def __call__(self, x: jax.Array, force_pallas: bool = False) -> jax.Array:
        # x: [B, S, D]; the Pallas grid restricts reads to the first S*D
        # columns of the flattened table (no host-side slice / extra copy).
        return add_position_encoding(x, self.pe_flat, force_pallas=force_pallas)


# ---------------------------------------------------------------------------
# Demo / self-check
# ---------------------------------------------------------------------------
if __name__ == "__main__":
    B, S, D = 2, 8, 32          # batch=2, win_size(seq)=8, d_model=32
    key = jax.random.PRNGKey(0)
    kx, kpe = jax.random.split(key)
    x = jax.random.normal(kx, (B, S, D), dtype=jnp.float32)

    # fixed mode (force_pallas exercises the kernel; reference computed first
    # so the buffer-donation path cannot interfere with the check)
    mod_fixed = AbsolutePositionEncoding("fixed", d_model=D, win_size=S)
    ref_fixed = x + mod_fixed.pe_table[None, :S, :]
    out_fixed = jax.block_until_ready(mod_fixed(x, force_pallas=True))
    assert out_fixed.shape == (B, S, D)
    assert jnp.allclose(out_fixed, ref_fixed, atol=1e-6)

    # learnable mode
    mod_learn = AbsolutePositionEncoding("learnable", d_model=D, win_size=S, key=kpe)
    ref_learn = x + mod_learn.pe_table[None, :S, :]
    out_learn = jax.block_until_ready(mod_learn(x, force_pallas=True))
    assert out_learn.shape == (B, S, D)
    assert jnp.allclose(out_learn, ref_learn, atol=1e-6)

    # bf16 path, larger batch -> exercises the dtype-aware TB=16 tile
    Bb = 16
    xb = jax.random.normal(kx, (Bb, S, D), dtype=jnp.float32).astype(jnp.bfloat16)
    mod_bf16 = AbsolutePositionEncoding("fixed", d_model=D, win_size=S, dtype=jnp.bfloat16)
    ref_bf16 = xb + mod_bf16.pe_table[None, :S, :]
    out_bf16 = jax.block_until_ready(mod_bf16(xb, force_pallas=True))
    assert out_bf16.dtype == jnp.bfloat16
    assert jnp.allclose(out_bf16.astype(jnp.float32), ref_bf16.astype(jnp.float32),
                        atol=1e-2)

    # small-problem fallback path (plain JAX) still matches
    out_fb = jax.block_until_ready(mod_fixed(x))
    assert jnp.allclose(out_fb, ref_fixed, atol=1e-6)

    print("KERNEL_OK")
</pallas_src>

<mosaic_0001>
module attributes {stable_mosaic.version = 11 : i64} {
  func.func @_add_pe_kernel(%arg0: i32, %arg1: i32, %arg2: memref<2x128xf32, #tpu.memory_space<vmem>>, %arg3: memref<1x128xf32, #tpu.memory_space<vmem>>, %arg4: memref<2x128xf32, #tpu.memory_space<vmem>>) attributes {dimension_semantics = [#tpu.dimension_semantics<parallel>, #tpu.dimension_semantics<parallel>], iteration_bounds = array<i64: 2, 1>, scalar_prefetch = 0 : i64, scratch_operands = 0 : i64, tpu.core_type = #tpu.core_type<tc>, window_params = [{transform_indices = @transform_0, window_bounds = array<i64: 2, 128>}, {transform_indices = @transform_1, window_bounds = array<i64: 1, 128>}, {transform_indices = @transform_2, window_bounds = array<i64: 2, 128>}]} {
    %c0 = arith.constant 0 : index
    %c0_0 = arith.constant 0 : index
    %0 = vector.load %arg2[%c0, %c0_0] : memref<2x128xf32, #tpu.memory_space<vmem>>, vector<2x128xf32>
    %c0_1 = arith.constant 0 : index
    %c0_2 = arith.constant 0 : index
    %1 = vector.load %arg3[%c0_1, %c0_2] : memref<1x128xf32, #tpu.memory_space<vmem>>, vector<1x128xf32>
    %2 = vector.broadcast %1 : vector<1x128xf32> to vector<2x128xf32>
    %3 = arith.addf %0, %2 : vector<2x128xf32>
    %c0_3 = arith.constant 0 : index
    %c0_4 = arith.constant 0 : index
    %4 = vector.load %arg4[%c0_3, %c0_4] : memref<2x128xf32, #tpu.memory_space<vmem>>, vector<2x128xf32>
    tpu.vector_store %arg4[%c0_3, %c0_4], %3 {strides = array<i32>} : memref<2x128xf32, #tpu.memory_space<vmem>>, vector<2x128xf32>,
    return
  }
  func.func @transform_0(%arg0: i32, %arg1: i32) -> (i32, i32) {
    %c0_i32 = arith.constant 0 : i32
    return %arg1, %arg0 : i32, i32
  }
  func.func @transform_1(%arg0: i32, %arg1: i32) -> (i32, i32) {
    %c0_i32 = arith.constant 0 : i32
    %c0_i32_0 = arith.constant 0 : i32
    return %c0_i32, %arg0 : i32, i32
  }
  func.func @transform_2(%arg0: i32, %arg1: i32) -> (i32, i32) {
    %c0_i32 = arith.constant 0 : i32
    return %arg1, %arg0 : i32, i32
  }
}

</mosaic_0001>

<bundles_post_ra>
// kernel: tpu_custom_call.1
= control target key start
LH: loop header
LB: loop body
LE: loop exit
PB: predicated region body
PF: predicated region fallthrough
CT: control target
= control target key end

     0   :  { %7 = vsyncpa [#allocation3], 0  ;;  %s639_s0 = inlined_call_operand.hbm [shape: f32[2,256], index: 0, kind: input, shape index: {}, may-alias: {0,2}]   ;;  %s640_s1 = inlined_call_operand.vmem [shape: f32[1,256], index: 1, kind: input, shape index: {}]   ;;  %s641_s2 = inlined_call_operand.hbm [shape: f32[2,256], index: 2, kind: output, shape index: {}, may-alias: {0,2}]  }
   0x1   :  { %9 = vsyncpa [#allocation3 + $0x1], 0 }
   0x2   :  { %10 = vsyncpa [#allocation4], 0 }
   0x3   :  { %12 = vsyncpa [#allocation4 + $0x1], 0  ;;  %s514_s9 = smov 0   ;;  %s516_s10 = smov 0  }
   0x4   :  { %s518_s11 = smov 0   ;;  %s520_s12 = smov 0  }
   0x5   :  { %s522_s13 = smov 0   ;;  %s524_s14 = smov 0  }
   0x6 LB: > { %s309_s15 = sadd.s32 4294967295, %s497_s14   ;;  %s310_s16 = sadd.s32 4294967294, %s497_s14   ;;  %s497_s14 = sphi %s524_s14, %s18_s14   ;;  %s493_s13 = sphi %s522_s13, %s650_s13   ;;  %s489_s12 = sphi %s520_s12, %s649_s12   ;;  %s485_s11 = sphi %s518_s11, %s648_s11   ;;  %s481_s10 = sphi %s516_s10, %s647_s10   ;;  %s477_s9 = sphi %s514_s9, %s646_s9  }
   0x7   : > { %s30_s17 = sadd.s32 1, %s493_s13  ;;  %s39_s18 = sadd.s32 1, %s485_s11 }
   0x8   : > { %p32_p0 = scmp.ge.s32.totalorder %s30_s17, 2  ;;  %p46_p1 = scmp.ne.s32.totalorder %s485_s11, %s481_s10 }
   0x9   : > { %p47_p2 = scmp.eq.s32.totalorder %s497_s14, 0  ;;  %p52_p3 = scmp.ne.s32.totalorder %s481_s10, %s477_s9 }
   0xa   : > { %s652_s17 = smov (%p32_p0, %s30_s17), 0  ;;  %p53_p5 = scmp.eq.s32.totalorder %s309_s15, 0 }
   0xb   : > { %p555_p4 = por %p47_p2, %p46_p1  ;;  %s35_s20 = ssub.s32 %s493_s13, %s652_s17 }
   0xc   : > { %p104_p6 = scmp.eq.s32.totalorder %s309_s15, 1  ;;  %p37_p7 = scmp.eq.s32.totalorder %s35_s20, 0 }
   0xd   : > { %p561_p8 = por %p53_p5, %p52_p3  ;;  %p110_p10 = scmp.eq.s32.totalorder %s310_s16, 1 }
   0xe   : > { %p565_p9 = por %p104_p6, %p46_p1  ;;  %p312_p12 = scmp.ge.s32.totalorder %s497_s14, 2 }
   0xf   : > { %s570_s23 = scalar_select %p37_p7, %s485_s11, %s39_s18  }
  0x10   : > { %p572_p11 = por %p110_p10, %p52_p3  ;;  %p334_p13 = scmp.lt.s32.totalorder %s497_s14, 2 }
  0x11   : > { %s130_s25 = sand.u32 1, %s485_s11   ;;  %s314_s27 = sshll.u32 %s493_s13, 1 }
  0x12   : > { %s313_s26 = sshll.u32 %s130_s25, 1  ;;  %s140_s30 = scalar_lea.hbm %s639_s0, %s314_s27 }
  0x13   : > { %s134_s3 = scalar_lea.vmem [#allocation2], %s313_s26  ;;  %s142_s5 = sshll.u32 %s140_s30, 4  ;;  %s143_s5 = int_to_ptr.hbm [resolvable:$true] %s142_s5 }
  0x14   : > { %s144_s4 = sshll.u32 %s134_s3, 4  ;;  %p327_p0 = pnand %p334_p13, %p555_p4  ;;  %s145_s4 = int_to_ptr.vmem [resolvable:$true] %s144_s4 }
  0x15   : > { %p315_p1 = scmp.ge.s32.totalorder %s497_s14, 1  ;;  %p155_p2 = scmp.lt.s32.totalorder %s497_s14, 3 }
  0x16   : > { %s131_s6 = scalar_lea.sflag [#allocation3], %s130_s25 }
  0x17   : > { %329 = dma.hbm_to_vmem [thread:$0]  (!%p327_p0), %s143_s5, 32, %s145_s4, %s131_s6  }
  0x18   : > { %p156_p3 = pnand %p315_p1, %p155_p2 }
  0x19   : > { %s588_s7 = sand.u32 (!%p156_p3), 1, %s481_s10  }
  0x1a   : > { %159 = sbr.rel (%p156_p3) target bundleno = 49 (0x31), region = 28  ;;  %s316_s8 = sshll.u32 (!%p156_p3), %s588_s7, 1 }
  0x1b   : > { %s162_s15 = scalar_lea.sflag (!%p156_p3), [#allocation3], %s588_s7  ;;  %s165_s16 = scalar_lea.vmem (!%p156_p3), [#allocation2], %s316_s8 }
  0x1f   : > { %468 = dma.done.wait (%p561_p8), %s162_s15, 32  }
  0x20   : > { %470 = vsyncadd (%p561_p8), %s162_s15, 4294967264  ;;  %p190_p4 = scmp.lt.s32.totalorder %s489_s12, 1  ;;  %s319_s19 = sshll.u32 %s489_s12, 1  ;;  %v193_v0 = vld [vmem:[%s165_s16] sm:$0x3] }
  0x21   : > { %s213_s29 = scalar_lea.hbm %s641_s2, %s319_s19  ;;  %s189_s30 = scalar_lea.vmem [#allocation5], %s316_s8 }
  0x22   : > { %s191_s18 = scalar_select %p190_p4, %s489_s12, 1 }
  0x23   : > { %s215_s3 = sshll.u32 %s189_s30, 4  ;;  %s217_s21 = sshll.u32 %s213_s29, 4  ;;  %s216_s3 = int_to_ptr.vmem [resolvable:$true] %s215_s3  ;;  %s218_s21 = int_to_ptr.hbm [resolvable:$true] %s217_s21 }
  0x24   : > { %s192_s26 = scalar_lea.vmem %s640_s1, %s191_s18  ;;  %s201_s4 = scalar_lea.sflag [#allocation4], %s588_s7 }
  0x25   : > { %v384_v1 = vld [vmem:[%s192_s26] ss:$0 sm:$0xff]  ;;  %s429_s12 = sshra.s32 %s218_s21, 4  ;;  %s435_s8 = scalar_lea.hbm %s641_s2, 4  ;;  %s430_s12 = int_to_ptr.hbm [resolvable:$true] %s429_s12 }
  0x26   : > { %v198_v2 = vadd.f32 %v384_v1, %v193_v0  ;;  %s431_s5 = scalar_lea.hbm %s430_s12, 2  ;;  %p436_p8 = scmp.lt.s32.totalorder %s430_s12, %s641_s2 }
  0x27   : > { %p432_p5 = scmp.ne.s32.totalorder %s430_s12, %s431_s5  ;;  %p437_p10 = scmp.lt.s32.totalorder %s435_s8, %s431_s5 }
  0x28   : > { %199 = vst [vmem:[%s189_s30] sm:$0x3] %v198_v2 }
  0x29   : > { %p433_p6 = pnand %p432_p5, %p565_p9  ;;  %p438_p13 = por %p437_p10, %p436_p8 }
  0x2b   : > { %p434_p7 = pneg %p433_p6 }
  0x2d   : > { %p439_p0 = pnand %p438_p13, %p434_p7 }
  0x2f   : > { %442 = shalt.err (!%p439_p0)
}
  0x30   : > { %324 = dma.vmem_to_hbm [thread:$0]  (%p565_p9), %s216_s3, 32, %s218_s21, %s201_s4  }
  0x31 PF: > { %s229_s7 = sand.u32 1, %s477_s9   ;;  %p331_p1 = pnand %p312_p12, %p572_p11 }
  0x32   : > { %s230_s16 = scalar_lea.sflag [#allocation4], %s229_s7 }
  0x33   : > { %p332_p2 = pneg %p331_p1 }
  0x35   : > { %472 = dma.done.wait (%p332_p2), %s230_s16, 32  }
  0x36   : > { %474 = vsyncadd (%p332_p2), %s230_s16, 4294967264  ;;  %s18_s14 = sadd.s32 1, %s497_s14   ;;  %s646_s9 = smov %s481_s10 }
  0x37   : > { %p15_p3 = scmp.ge.s32.totalorder %s18_s14, 4   ;;  %s647_s10 = smov %s485_s11 }
  0x38   : > { %s648_s11 = smov %s570_s23  ;;  %s649_s12 = smov %s493_s13 }
  0x39   : > { %s650_s13 = smov %s652_s17  ;;  %17 = sbr.rel (!%p15_p3) target bundleno = 6 (0x6), region = 76 }
  0x3e   :  { %236 = vsyncpa [#allocation3], 1 }
  0x3f   :  { %238 = vsyncpa [#allocation3 + $0x1], 1 }
  0x40   :  { %239 = vsyncpa [#allocation4], 1 }
  0x41   :  { %241 = vsyncpa [#allocation4 + $0x1], 1 }

</bundles_post_ra>
